<compile_context>
chip_gen: v5e
topology: v5e:2x2
jax: 0.10.0
libtpu: 0.0.40
codegen_flags: <defaults>
</compile_context>

<pallas_src>
import jax
import jax.numpy as jnp
from jax.experimental import pallas as pl
from jax.experimental.pallas import tpu as pltpu


def _attention_kernel(x_ref, w_ref, out_ref):
    # x_ref:   (TB, S, H) VMEM tile of lstm_output (native dtype)
    # w_ref:   (1, H)     VMEM attention-weight row (same dtype as x)
    # out_ref: (TB, H)    VMEM context output tile
    x = x_ref[...]                                   # (TB, S, H), native dtype
    w = w_ref[...]                                   # (1, H), native dtype

    # scores[b, s] = sum_h x[b, s, h] * w[h]
    # VPU multiply in native dtype, f32 accumulation in the lane reduce.
    # The Linear bias is omitted: softmax over dim=1 is shift-invariant.
    scores = jnp.sum(x * w[None, :, :], axis=-1, dtype=jnp.float32)  # (TB, S)

    # Softmax over the sequence axis (dim=1 of the original (B, S, 1) logits).
    m = jnp.max(scores, axis=-1, keepdims=True)       # (TB, 1)
    e = jnp.exp(scores - m)                           # (TB, S)
    denom = jnp.sum(e, axis=-1, keepdims=True)        # (TB, 1)
    attn = e * pl.reciprocal(denom, approx=False)     # exact normalization

    # context = sum_s attn[s] * x[s, :]
    # multiply in native dtype, accumulate the sublane reduce in f32.
    ctx = jnp.sum(attn.astype(x.dtype)[:, :, None] * x, axis=1,
                  dtype=jnp.float32)                  # (TB, H)
    out_ref[...] = ctx.astype(out_ref.dtype)


def _sublane_pack(dtype):
    # Sublane packing factor for the second-minor output dim:
    # 8 for 4-byte, 16 for 2-byte, 32 for 1-byte dtypes.
    return max(8, 32 // jnp.dtype(dtype).itemsize)


def _choose_block_b(B, S, H, dtype, target_bytes):
    """Pick a batch-tile size whose x slab is ~target_bytes, pack-aligned."""
    pack = _sublane_pack(dtype)
    per_row = S * H * jnp.dtype(dtype).itemsize
    tb = max(1, target_bytes // per_row)
    tb = max(pack, (tb // pack) * pack)
    if tb >= B:
        if B >= 2 * pack:
            # Whole batch fits one tile, but keep >= 2 grid blocks so both
            # v7x TensorCores get work on the "parallel" axis.  block_b stays
            # a pack multiple and strictly < B, so the spec remains legal.
            half = -(-B // 2)                    # ceil(B / 2)
            tb = -(-half // pack) * pack         # round up to pack
        else:
            tb = B                               # full-dim block: always legal
    return min(tb, B)


def attention_forward(lstm_output, w, b=None, *, block_b=None,
                      vmem_target_bytes=2 * 1024 * 1024):
    """lstm_output: (B, S, H); w: (H, 1); b: (1,) (ignored -- see below).

    Returns the attention-pooled context, shape (B, H).

    The Linear bias `b` is accepted for parity with the PyTorch module but is
    not used: softmax over the sequence axis is invariant to a constant shift,
    so the bias cannot affect the output.
    """
    del b  # mathematical no-op (softmax shift invariance)
    B, S, H = lstm_output.shape
    x = lstm_output

    if block_b is None:
        block_b = _choose_block_b(B, S, H, x.dtype, vmem_target_bytes)

    num_blocks = pl.cdiv(B, block_b)                 # ragged tail allowed

    # Lane-dense weight row in the input dtype (keeps the VPU multiply narrow).
    w_row = w.reshape(1, H).astype(x.dtype)

    out = pl.pallas_call(
        _attention_kernel,
        out_shape=jax.ShapeDtypeStruct((B, H), lstm_output.dtype),
        grid_spec=pltpu.PrefetchScalarGridSpec(
            num_scalar_prefetch=0,
            grid=(num_blocks,),
            in_specs=[
                pl.BlockSpec((block_b, S, H), lambda i: (i, 0, 0)),  # x tile
                pl.BlockSpec((1, H), lambda i: (0, 0)),              # weights
            ],
            out_specs=pl.BlockSpec((block_b, H), lambda i: (i, 0)),
        ),
        compiler_params=pltpu.CompilerParams(
            dimension_semantics=("parallel",),
            vmem_limit_bytes=32 * 1024 * 1024,
        ),
    )(x, w_row)

    return out


def attention_reference(lstm_output, w, b):
    scores = jnp.einsum("bsh,ho->bso", lstm_output, w) + b   # (B, S, 1)
    weights = jax.nn.softmax(scores, axis=1)
    return jnp.sum(weights * lstm_output, axis=1)            # (B, H)


if __name__ == "__main__":
    key = jax.random.PRNGKey(0)
    k_x, k_w, k_b, k_x2, k_x3 = jax.random.split(key, 5)

    B, S, H = 2, 8, 32
    x = jax.random.normal(k_x, (B, S, H), dtype=jnp.float32)

    # Deterministic parameter init mimicking nn.Linear(H, 1):
    # uniform(-1/sqrt(H), 1/sqrt(H)) for both weight and bias.
    bound = 1.0 / (H ** 0.5)
    w = jax.random.uniform(k_w, (H, 1), minval=-bound, maxval=bound,
                           dtype=jnp.float32)
    b = jax.random.uniform(k_b, (1,), minval=-bound, maxval=bound,
                           dtype=jnp.float32)

    # Case 1: small batch, single grid step, f32.
    out = attention_forward(x, w, b)
    out = jax.block_until_ready(out)
    ref = attention_reference(x, w, b)
    assert out.shape == (B, H), out.shape
    assert jnp.allclose(out, ref, atol=1e-5, rtol=1e-5), \
        f"max abs err {jnp.max(jnp.abs(out - ref))}"

    # Case 2: multi-block grid with a ragged tail (no host padding; exercises
    # the partial last block / masked store path).
    B2 = 20
    x2 = jax.random.normal(k_x2, (B2, S, H), dtype=jnp.float32)
    out2 = attention_forward(x2, w, b, block_b=8)
    out2 = jax.block_until_ready(out2)
    ref2 = attention_reference(x2, w, b)
    assert out2.shape == (B2, H), out2.shape
    assert jnp.allclose(out2, ref2, atol=1e-5, rtol=1e-5), \
        f"max abs err {jnp.max(jnp.abs(out2 - ref2))}"

    # Case 3: bf16 inputs (exercises the native-dtype multiply + f32-accum
    # path).  Compared against the f32 reference with a bf16-level tolerance.
    B3 = 16
    x3 = jax.random.normal(k_x3, (B3, S, H), dtype=jnp.float32)
    out3 = attention_forward(x3.astype(jnp.bfloat16), w, b)
    out3 = jax.block_until_ready(out3)
    ref3 = attention_reference(x3, w, b)
    assert out3.shape == (B3, H), out3.shape
    assert jnp.allclose(out3.astype(jnp.float32), ref3, atol=3e-2, rtol=3e-2), \
        f"max abs err {jnp.max(jnp.abs(out3.astype(jnp.float32) - ref3))}"

    print("KERNEL_OK")
</pallas_src>

<mosaic_0001>
module attributes {stable_mosaic.version = 11 : i64} {
  func.func @_attention_kernel(%arg0: i32, %arg1: memref<2x8x32xf32, #tpu.memory_space<vmem>>, %arg2: memref<1x32xf32, #tpu.memory_space<vmem>>, %arg3: memref<2x32xf32, #tpu.memory_space<vmem>>) attributes {dimension_semantics = [#tpu.dimension_semantics<parallel>], iteration_bounds = array<i64: 1>, scalar_prefetch = 0 : i64, scratch_operands = 0 : i64, tpu.core_type = #tpu.core_type<tc>, window_params = [{transform_indices = @transform_0, window_bounds = array<i64: 2, 8, 32>}, {pipeline_mode = #tpu.pipeline_mode<synchronous>, transform_indices = @transform_1, window_bounds = array<i64: 1, 32>}, {transform_indices = @transform_2, window_bounds = array<i64: 2, 32>}]} {
    %c0 = arith.constant 0 : index
    %c0_0 = arith.constant 0 : index
    %c0_1 = arith.constant 0 : index
    %0 = vector.load %arg1[%c0, %c0_0, %c0_1] : memref<2x8x32xf32, #tpu.memory_space<vmem>>, vector<2x8x32xf32>
    %c0_2 = arith.constant 0 : index
    %c0_3 = arith.constant 0 : index
    %1 = vector.load %arg2[%c0_2, %c0_3] : memref<1x32xf32, #tpu.memory_space<vmem>>, vector<1x32xf32>
    %2 = vector.shape_cast %1 : vector<1x32xf32> to vector<1x1x32xf32>
    %3 = vector.broadcast %2 : vector<1x1x32xf32> to vector<2x8x32xf32>
    %4 = arith.mulf %0, %3 : vector<2x8x32xf32>
    %cst = arith.constant dense<0.000000e+00> : vector<2x8xf32>
    %5 = vector.multi_reduction <add>, %4, %cst [2] : vector<2x8x32xf32> to vector<2x8xf32>
    %cst_4 = arith.constant dense<0xFF800000> : vector<2xf32>
    %6 = vector.multi_reduction <maximumf>, %5, %cst_4 [1] : vector<2x8xf32> to vector<2xf32>
    %7 = vector.shape_cast %6 : vector<2xf32> to vector<2x1xf32>
    %8 = vector.broadcast %7 : vector<2x1xf32> to vector<2x8xf32>
    %9 = arith.subf %5, %8 : vector<2x8xf32>
    %10 = math.exp %9 : vector<2x8xf32>
    %cst_5 = arith.constant dense<0.000000e+00> : vector<2xf32>
    %11 = vector.multi_reduction <add>, %10, %cst_5 [1] : vector<2x8xf32> to vector<2xf32>
    %12 = vector.shape_cast %11 : vector<2xf32> to vector<2x1xf32>
    %13 = tpu.reciprocal %12 : vector<2x1xf32> -> vector<2x1xf32>
    %14 = vector.broadcast %13 : vector<2x1xf32> to vector<2x8xf32>
    %15 = arith.mulf %10, %14 : vector<2x8xf32>
    %16 = vector.shape_cast %15 : vector<2x8xf32> to vector<2x8x1xf32>
    %17 = vector.broadcast %16 : vector<2x8x1xf32> to vector<2x8x32xf32>
    %18 = arith.mulf %17, %0 : vector<2x8x32xf32>
    %cst_6 = arith.constant dense<0.000000e+00> : vector<2x32xf32>
    %19 = vector.multi_reduction <add>, %18, %cst_6 [1] : vector<2x8x32xf32> to vector<2x32xf32>
    %c0_7 = arith.constant 0 : index
    %c0_8 = arith.constant 0 : index
    %20 = vector.load %arg3[%c0_7, %c0_8] : memref<2x32xf32, #tpu.memory_space<vmem>>, vector<2x32xf32>
    tpu.vector_store %arg3[%c0_7, %c0_8], %19 {strides = array<i32>} : memref<2x32xf32, #tpu.memory_space<vmem>>, vector<2x32xf32>,
    return
  }
  func.func @transform_0(%arg0: i32) -> (i32, i32, i32) {
    %c0_i32 = arith.constant 0 : i32
    %c0_i32_0 = arith.constant 0 : i32
    %c0_i32_1 = arith.constant 0 : i32
    return %arg0, %c0_i32, %c0_i32_0 : i32, i32, i32
  }
  func.func @transform_1(%arg0: i32) -> (i32, i32) {
    %c0_i32 = arith.constant 0 : i32
    %c0_i32_0 = arith.constant 0 : i32
    %c0_i32_1 = arith.constant 0 : i32
    return %c0_i32, %c0_i32_0 : i32, i32
  }
  func.func @transform_2(%arg0: i32) -> (i32, i32) {
    %c0_i32 = arith.constant 0 : i32
    %c0_i32_0 = arith.constant 0 : i32
    return %arg0, %c0_i32 : i32, i32
  }
}

</mosaic_0001>

<bundles_post_ra>
// kernel: tpu_custom_call.1
= control target key start
LH: loop header
LB: loop body
LE: loop exit
PB: predicated region body
PF: predicated region fallthrough
CT: control target
= control target key end

     0   :  { %7 = vsyncpa [#allocation3], 0  ;;  %s308_s0 = inlined_call_operand.hbm [shape: f32[2,8,32], index: 0, kind: input, shape index: {}]   ;;  %s309_s1 = inlined_call_operand.hbm [shape: f32[1,32], index: 1, kind: input, shape index: {}]   ;;  %s310_s2 = inlined_call_operand.hbm [shape: f32[2,32], index: 2, kind: output, shape index: {}]  }
   0x1   :  { %8 = vsyncpa [#allocation6], 0 }
   0x2   :  { %9 = vsyncpa [#allocation4], 0  ;;  %s14_s11 = sshll.u32 %s308_s0, 4  ;;  %s261_s12 = smov [#allocation2]   ;;  %s15_s11 = int_to_ptr.hbm [resolvable:$true] %s14_s11 }
   0x3   :  { %s16_s13 = sshll.u32 %s261_s12, 4  ;;  %s28_s16 = sshll.u32 %s309_s1, 4  ;;  %s17_s13 = int_to_ptr.vmem [resolvable:$true] %s16_s13  ;;  %s29_s16 = int_to_ptr.hbm [resolvable:$true] %s28_s16 }
   0x4   :  { %s262_s17 = smov 128   ;;  %s263_s18 = smov 8  }
   0x5   :  { %22 = dma.hbm_to_vmem [thread:$0]  %s15_s11, 256, %s17_s13, [#allocation3], %s262_s17, %s262_s17, %s263_s18  }
   0x6   :  { %s264_s19 = smov [#allocation5]  }
   0x7   :  { %s30_s20 = sshll.u32 %s264_s19, 4  ;;  %s31_s20 = int_to_ptr.vmem [resolvable:$true] %s30_s20 }
   0x8   :  { %33 = dma.hbm_to_vmem [thread:$0]  %s29_s16, 16, %s31_s20, [#allocation6]  }
   0x9   :  { %255 = dma.done.wait [#allocation3], 256  }
   0xa   :  { %256 = vsyncadd [#allocation3], 4294967040 }
   0xb   :  { %257 = dma.done.wait [#allocation6], 16  }
   0xc   :  { %258 = vsyncadd [#allocation6], 4294967280  ;;  %v288_v0 = vld [vmem:[#allocation2] sm:$0xff]  ;;  %v176_v1 = vld [vmem:[#allocation5] ss:$0 sm:$0xff]  ;;  %vm50_vm0 = vcmask 261120   ;;  %v59_v8 = vlaneseq }
   0xd   :  { %v48_v2 = vmul.f32 %v176_v1, %v288_v0  ;;  %v291_v3 = vld [vmem:[#allocation2 + $0x8] sm:$0xff]  ;;  %vm63_vm1 = vcmask 1041409   ;;  %vm66_vm2 = vcmask 58368   ;;  %v265_v15 = vmov 0   ;;  %s266_s0 = smov [#allocation7]   ;;  %s156_s23 = sshll.u32 %s310_s2, 4  ;;  %s157_s23 = int_to_ptr.hbm [resolvable:$true] %s156_s23 }
   0xe   :  { %v49_v5 = vmul.f32 %v176_v1, %v291_v3  ;;  %v60_v9 = vand.u32 127, %v59_v8  ;;  %174 = vset.pattern.permute.xlu2 %v265_v15  ;;  %173 = vset.pattern.permute.xlu1 %v265_v15  ;;  %s154_s1 = sshll.u32 %s266_s0, 4  ;;  %vm147_vm7 = vcmask 254976   ;;  %s155_s1 = int_to_ptr.vmem [resolvable:$true] %s154_s1 }
   0xf   :  { %v51_v4 = vsel %vm50_vm0, %v48_v2, 0.0  ;;  %175 = vset.pattern.permute.xlu0 %v265_v15 }
  0x10   :  { %52 = vadd.xlane.f32.xlu0 %v51_v4  ;;  %v54_v6 = vsel %vm50_vm0, %v49_v5, 0.0 }
  0x18   :  { %55 = vadd.xlane.f32.xlu0 %v54_v6 }
  0x83   :  { %v53_v7 = vpop.xlane.xlu0 %52 }
  0x84   :  { %v61_v11 = vperm.slane %v53_v7, %v60_v9 }
  0x8b   :  { %v56_v10 = vpop.xlane.xlu0 %55 }
  0x8c   :  { %v62_v12 = vperm.slane %v56_v10, %v60_v9 }
  0x8e   :  { %v64_v13 = vsel %vm63_vm1, %v62_v12, %v61_v11 }
  0x8f   :  { %v67_v14 = vsel %vm66_vm2, %v64_v13, -inf }
  0x90   :  { %68 = vmax.xlane.f32.xlu1 %v67_v14 }
 0x103   :  { %v69_v16 = vpop.xlane.xlu1 %68 }
 0x104   :  { %v71_v17 = vperm.slane %v69_v16, 0  ;;  %v72_v18 = vperm.slane %v69_v16, 1 }
 0x106   :  { %v75_v19 = vsub.f32 %v53_v7, %v71_v17  ;;  %v76_v20 = vsub.f32 %v56_v10, %v72_v18 }
 0x108   :  { %v77_v21 = vmul.f32 1.442695, %v75_v19  ;;  %v79_v22 = vmul.f32 1.442695, %v76_v20 }
 0x10a   :  { %177 = vpow2.f32 %v77_v21 }
 0x10b   :  { %179 = vpow2.f32 %v79_v22 }
 0x110   :  { %v178_v23 = vpop.eup %177 }
 0x111   :  { %v180_v24 = vpop.eup %179  ;;  %84 = vperm.xlu1 %173, %v178_v23  }
 0x112   :  { %87 = vperm.xlu2 %174, %v180_v24  }
 0x16c   :  { %v88_v25 = vpop.permute.xlu2 %87 }
 0x16d   :  { %v90_v27 = vperm.slane %v88_v25, %v60_v9 }
 0x183   :  { %v85_v26 = vpop.permute.xlu1 %84 }
 0x184   :  { %v89_v28 = vperm.slane %v85_v26, %v60_v9 }
 0x186   :  { %v91_v29 = vsel %vm63_vm1, %v90_v27, %v89_v28 }
 0x187   :  { %v93_v30 = vsel %vm66_vm2, %v91_v29, 0.0 }
 0x188   :  { %94 = vadd.xlane.f32.xlu2 %v93_v30 }
 0x1fb   :  { %v95_v31 = vpop.xlane.xlu2 %94 }
 0x1fc   :  { %181 = vrcp.f32 %v95_v31  ;;  %v107_v35 = vand.u32 2147483648, %v95_v31  ;;  %v105_v37 = vand.u32 2147483647, %v95_v31  ;;  %vm101_vm4 = vweird.f32 %v95_v31 }
 0x1fe   :  { %v108_v39 = vor.u32 1.1754944e-38, %v107_v35  ;;  %vm106_vm6 = vcmp.eq.f32.partialorder %v105_v37, 8.507059e+37 }
 0x202   :  { %v182_v32 = vpop.eup %181 }
 0x203   :  { %v97_v33 = vmul.f32 %v182_v32, %v95_v31  ;;  %vm102_vm3 = vweird.f32 %v182_v32 }
 0x204   :  { %vm103_vm5 = vmor %vm101_vm4, %vm102_vm3 }
 0x205   :  { %v98_v34 = vsub.f32 1.0, %v97_v33 }
 0x207   :  { %v99_v36 = vmul.f32 %v182_v32, %v98_v34 }
 0x209   :  { %v100_v38 = vadd.f32 %v182_v32, %v99_v36 }
 0x20b   :  { %v104_v40 = vsel %vm103_vm5, %v182_v32, %v100_v38 }
 0x20c   :  { %v109_v41 = vsel %vm106_vm6, %v108_v39, %v104_v40 }
 0x20d   :  { %v112_v42 = vperm.slane %v109_v41, 1  ;;  %v111_v43 = vperm.slane %v109_v41, 0 }
 0x20f   :  { %v116_v44 = vmul.f32 %v180_v24, %v112_v42  ;;  %v115_v45 = vmul.f32 %v178_v23, %v111_v43 }
 0x211   :  { %124 = vperm.xlu1 %173, %v116_v44   ;;  %119 = vperm.xlu0 %175, %v115_v45  }
 0x283   :  { %v125_v46 = vpop.permute.xlu1 %124  ;;  %v120_v47 = vpop.permute.xlu0 %119 }
 0x284   :  { %v128_v48 = vmul.f32 %v125_v46, %v291_v3  ;;  %v127_v49 = vmul.f32 %v120_v47, %v288_v0 }
 0x286   :  { %v136_v50 = vsel %vm50_vm0, %v128_v48, 0.0  ;;  %v129_v51 = vsel %vm50_vm0, %v127_v49, 0.0 }
 0x287   :  { %v137_v52 = vrot.slane %v136_v50, 4  ;;  %v130_v53 = vrot.slane %v129_v51, 4 }
 0x289   :  { %v138_v54 = vadd.f32 %v137_v52, %v136_v50  ;;  %v131_v55 = vadd.f32 %v130_v53, %v129_v51 }
 0x28b   :  { %v139_v56 = vrot.slane %v138_v54, 2  ;;  %v132_v57 = vrot.slane %v131_v55, 2 }
 0x28d   :  { %v140_v58 = vadd.f32 %v139_v56, %v138_v54  ;;  %v133_v59 = vadd.f32 %v132_v57, %v131_v55 }
 0x28f   :  { %v141_v60 = vrot.slane %v140_v58, 1  ;;  %v134_v61 = vrot.slane %v133_v59, 1 }
 0x291   :  { %v142_v62 = vadd.f32 %v141_v60, %v140_v58  ;;  %v135_v63 = vadd.f32 %v134_v61, %v133_v59 }
 0x293   :  { %v145_v0 = vsel %vm63_vm1, %v142_v62, %v135_v63 }
 0x294   :  { %148 = vst.msk [vmem:[#allocation7] sm:$0x3] %vm147_vm7, %v145_v0 }
 0x295   :  { %159 = dma.vmem_to_hbm [thread:$0]  %s155_s1, 32, %s157_s23, [#allocation4]  }
 0x296   :  { %259 = dma.done.wait [#allocation4], 32  }
 0x297   :  { %260 = vsyncadd [#allocation4], 4294967264 }
 0x298   :  { %164 = vsyncpa [#allocation3], 1 }
 0x299   :  { %165 = vsyncpa [#allocation6], 1 }
 0x29a   :  { %166 = vsyncpa [#allocation4], 1 }

</bundles_post_ra>
